<compile_context>
chip_gen: v7x
topology: tpu7x:2x2x1
jax: 0.10.0
libtpu: 0.0.40
codegen_flags: <defaults>
</compile_context>

<pallas_src>
import jax
import jax.numpy as jnp
from jax.experimental import pallas as pl
from jax.experimental.pallas import tpu as pltpu

HIDDEN = 128  # GCNConv(num_features, 128)


def _round_up(v, m):
    return ((v + m - 1) // m) * m


def _cdiv(a, b):
    return -(-a // b)


def gcn_relu_kernel(a_ref, xw_ref, b_ref, out_ref, act_ref, acc_ref):
    """One (tm, tk) tile of A_hat against one (tk, H) tile of XW.

    acc_ref: (tm, H) f32 accumulator, persistent across the contraction (k) axis.
    """
    k = pl.program_id(1)

    @pl.when(k == 0)
    def _init():
        acc_ref[...] = jnp.zeros_like(acc_ref)

    # Single lane-dense MXU matmul per tile, f32 accumulation.
    acc_ref[...] += jnp.dot(a_ref[...], xw_ref[...],
                            preferred_element_type=jnp.float32)

    @pl.when(k == pl.num_programs(1) - 1)
    def _finalize():
        z = acc_ref[...] + b_ref[...]
        out_ref[...] = z.astype(out_ref.dtype)                     # one_layer_output
        act_ref[...] = jnp.maximum(z, 0.0).astype(act_ref.dtype)   # activated_output


def _vmem_capacity_bytes():
    try:
        return int(pltpu.get_tpu_info().vmem_capacity_bytes)
    except Exception:
        return 64 * 1024 * 1024  # conservative fallback (v7x per-TC VMEM)


def gcn_one_layer(x, edge_index, weight, bias, *, compute_dtype=jnp.bfloat16):
    """x: (N, F) f32; edge_index: (2, E) int32 (row 0 = src, row 1 = dst);
       weight: (F, H); bias: (H,).  Returns (one_layer_output, activated_output), f32."""
    n, f = x.shape
    h = weight.shape[1]
    assert bias.shape == (h,)

    a_item = jnp.dtype(compute_dtype).itemsize
    align_m = 16 if a_item < 4 else 8

    # ---- tile geometry -----------------------------------------------------
    # Row axis: always >= 2 balanced tiles (both TensorCores on v7x), <= 512 rows
    # per tile (~85% of HBM roofline for pipelined streaming per measured data).
    tm_max = 512
    g_m = max(2, _cdiv(n, tm_max))
    tm = _round_up(_cdiv(n, g_m), align_m)
    m_pad = g_m * tm

    # Contraction axis: sized from the per-core VMEM budget, accounting for
    # double-buffering of every streamed operand plus the f32 accumulator.
    capacity = _vmem_capacity_bytes()
    budget = int(capacity * 0.70)
    fixed = (2 * 2 * tm * h * 4       # two f32 output tiles, double-buffered
             + tm * h * 4             # f32 accumulator scratch
             + 2 * 2 * h * 4          # bias, double-buffered (tiny)
             + (1 << 20))             # slack
    per_tk = 2 * tm * a_item + 2 * h * a_item   # A tile + XW tile, double-buffered
    tk_cap = max(128, ((budget - fixed) // per_tk) // 128 * 128)
    tk_cap = min(tk_cap, _round_up(n, 128))     # no point exceeding full contraction
    g_k = _cdiv(n, tk_cap)
    tk = _round_up(_cdiv(n, g_k), 128)
    k_pad = g_k * tk

    vmem_estimate = fixed + per_tk * tk
    vmem_limit = int(min(capacity - (2 << 20), vmem_estimate + (8 << 20)))
    vmem_limit = max(vmem_limit, 32 * 1024 * 1024)

    # ---- normalized adjacency: single scatter pass, built directly at padded
    # shape in the streaming dtype (no f32 N^2 intermediate, no separate pad copy).
    src = edge_index[0]
    dst = edge_index[1]
    deg = jnp.ones((n,), jnp.float32).at[dst].add(1.0)      # in-degree + self-loop
    dinv = jax.lax.rsqrt(deg)                                # deg >= 1 always
    idx = jnp.arange(n)
    a_hat = (jnp.zeros((m_pad, k_pad), compute_dtype)
             .at[dst, src].add((dinv[dst] * dinv[src]).astype(compute_dtype))
             .at[idx, idx].add((dinv * dinv).astype(compute_dtype)))

    # XW = X @ W computed once in f32 (O(N*F*H), negligible), padded on the
    # contraction axis, streamed in the compute dtype.
    xw = jnp.dot(x.astype(jnp.float32), weight.astype(jnp.float32))
    if k_pad != n:
        xw = jnp.pad(xw, ((0, k_pad - n), (0, 0)))
    xw = xw.astype(compute_dtype)
    b2d = bias.reshape(1, h).astype(jnp.float32)

    grid = (g_m, g_k)
    out, act = pl.pallas_call(
        gcn_relu_kernel,
        out_shape=(jax.ShapeDtypeStruct((m_pad, h), jnp.float32),
                   jax.ShapeDtypeStruct((m_pad, h), jnp.float32)),
        grid=grid,
        in_specs=[
            pl.BlockSpec((tm, tk), lambda i, k: (i, k)),   # A_hat tile (streamed)
            pl.BlockSpec((tk, h), lambda i, k: (k, 0)),    # XW tile (streamed over k)
            pl.BlockSpec((1, h), lambda i, k: (0, 0)),     # bias (tiny)
        ],
        out_specs=(
            pl.BlockSpec((tm, h), lambda i, k: (i, 0)),    # one_layer_output (lane-dense)
            pl.BlockSpec((tm, h), lambda i, k: (i, 0)),    # activated_output
        ),
        scratch_shapes=[pltpu.VMEM((tm, h), jnp.float32)],
        compiler_params=pltpu.CompilerParams(
            dimension_semantics=("parallel", "arbitrary"),
            vmem_limit_bytes=vmem_limit),
    )(a_hat, xw, b2d)

    if m_pad != n:
        out = out[:n]
        act = act[:n]
    return out, act


def reference(x, edge_index, weight, bias):
    n = x.shape[0]
    src, dst = edge_index[0], edge_index[1]
    adj = jnp.zeros((n, n), jnp.float32).at[dst, src].add(1.0) + jnp.eye(n)
    deg = adj.sum(axis=1)
    dinv = jnp.where(deg > 0, jax.lax.rsqrt(deg), 0.0)
    a_hat = dinv[:, None] * adj * dinv[None, :]
    out = a_hat @ (x @ weight) + bias
    return out, jnp.maximum(out, 0.0)


if __name__ == "__main__":
    num_nodes = 8
    num_features = 16
    hidden = HIDDEN          # GCNConv(num_features, 128)
    num_edges = 24

    key = jax.random.PRNGKey(0)
    kx, ke, kw = jax.random.split(key, 3)

    x = jax.random.normal(kx, (num_nodes, num_features), jnp.float32)
    edge_index = jax.random.randint(ke, (2, num_edges), 0, num_nodes, jnp.int32)
    # Glorot-like deterministic init for the GCNConv linear weight, zero bias.
    limit = (6.0 / (num_features + hidden)) ** 0.5
    weight = jax.random.uniform(kw, (num_features, hidden), jnp.float32,
                                minval=-limit, maxval=limit)
    bias = jnp.zeros((hidden,), jnp.float32)

    ref_out, ref_act = reference(x, edge_index, weight, bias)

    # Default path: bf16-streamed A_hat / XW (the HBM-bound operands), f32 accumulation.
    one_layer_output, activated_output = gcn_one_layer(x, edge_index, weight, bias)
    jax.block_until_ready((one_layer_output, activated_output))
    assert jnp.allclose(one_layer_output, ref_out, atol=5e-2, rtol=5e-2)
    assert jnp.allclose(activated_output, ref_act, atol=5e-2, rtol=5e-2)

    # Exact f32 path (same kernel, wider streams) matches the reference tightly.
    out_f32, act_f32 = gcn_one_layer(x, edge_index, weight, bias,
                                     compute_dtype=jnp.float32)
    jax.block_until_ready((out_f32, act_f32))
    assert jnp.allclose(out_f32, ref_out, atol=1e-4, rtol=1e-4)
    assert jnp.allclose(act_f32, ref_act, atol=1e-4, rtol=1e-4)

    print("KERNEL_OK")
</pallas_src>

<mosaic_0001>
module attributes {stable_mosaic.version = 11 : i64} {
  func.func @gcn_relu_kernel(%arg0: i32, %arg1: i32, %arg2: memref<16x128xbf16, #tpu.memory_space<vmem>>, %arg3: memref<128x128xbf16, #tpu.memory_space<vmem>>, %arg4: memref<1x128xf32, #tpu.memory_space<vmem>>, %arg5: memref<16x128xf32, #tpu.memory_space<vmem>>, %arg6: memref<16x128xf32, #tpu.memory_space<vmem>>, %arg7: memref<16x128xf32, #tpu.memory_space<vmem>>) attributes {dimension_semantics = [#tpu.dimension_semantics<parallel>, #tpu.dimension_semantics<arbitrary>], iteration_bounds = array<i64: 2, 1>, scalar_prefetch = 0 : i64, scratch_operands = 1 : i64, tpu.core_type = #tpu.core_type<tc>, window_params = [{transform_indices = @transform_0, window_bounds = array<i64: 16, 128>}, {transform_indices = @transform_1, window_bounds = array<i64: 128, 128>}, {pipeline_mode = #tpu.pipeline_mode<synchronous>, transform_indices = @transform_2, window_bounds = array<i64: 1, 128>}, {transform_indices = @transform_3, window_bounds = array<i64: 16, 128>}, {transform_indices = @transform_4, window_bounds = array<i64: 16, 128>}]} {
    %c0_i32 = arith.constant 0 : i32
    %0 = arith.cmpi eq, %arg1, %c0_i32 : i32
    %1 = arith.extui %0 : i1 to i32
    %c0_i32_0 = arith.constant 0 : i32
    %2 = arith.cmpi ne, %1, %c0_i32_0 : i32
    scf.if %2 {
      %cst_10 = arith.constant 0.000000e+00 : f32
      %12 = vector.broadcast %cst_10 : f32 to vector<16x128xf32>
      %c0_11 = arith.constant 0 : index
      %c0_12 = arith.constant 0 : index
      %13 = vector.load %arg7[%c0_11, %c0_12] : memref<16x128xf32, #tpu.memory_space<vmem>>, vector<16x128xf32>
      tpu.vector_store %arg7[%c0_11, %c0_12], %12 {strides = array<i32>} : memref<16x128xf32, #tpu.memory_space<vmem>>, vector<16x128xf32>,
    } else {
    }
    %c0 = arith.constant 0 : index
    %c0_1 = arith.constant 0 : index
    %3 = vector.load %arg7[%c0, %c0_1] : memref<16x128xf32, #tpu.memory_space<vmem>>, vector<16x128xf32>
    %c0_2 = arith.constant 0 : index
    %c0_3 = arith.constant 0 : index
    %4 = vector.load %arg2[%c0_2, %c0_3] : memref<16x128xbf16, #tpu.memory_space<vmem>>, vector<16x128xbf16>
    %c0_4 = arith.constant 0 : index
    %c0_5 = arith.constant 0 : index
    %5 = vector.load %arg3[%c0_4, %c0_5] : memref<128x128xbf16, #tpu.memory_space<vmem>>, vector<128x128xbf16>
    %cst = arith.constant dense<0.000000e+00> : vector<16x128xf32>
    %6 = tpu.matmul %4, %5, %cst {dimension_numbers = #tpu.dot_dimension_numbers<[1], [0], [0], [1], [0, 0, 1, 1], [], []>} : vector<16x128xbf16>, vector<128x128xbf16>, vector<16x128xf32> -> vector<16x128xf32>
    %7 = arith.addf %3, %6 : vector<16x128xf32>
    %c0_6 = arith.constant 0 : index
    %c0_7 = arith.constant 0 : index
    %8 = vector.load %arg7[%c0_6, %c0_7] : memref<16x128xf32, #tpu.memory_space<vmem>>, vector<16x128xf32>
    tpu.vector_store %arg7[%c0_6, %c0_7], %7 {strides = array<i32>} : memref<16x128xf32, #tpu.memory_space<vmem>>, vector<16x128xf32>,
    %c0_i32_8 = arith.constant 0 : i32
    %9 = arith.cmpi eq, %arg1, %c0_i32_8 : i32
    %10 = arith.extui %9 : i1 to i32
    %c0_i32_9 = arith.constant 0 : i32
    %11 = arith.cmpi ne, %10, %c0_i32_9 : i32
    scf.if %11 {
      %c0_10 = arith.constant 0 : index
      %c0_11 = arith.constant 0 : index
      %12 = vector.load %arg7[%c0_10, %c0_11] : memref<16x128xf32, #tpu.memory_space<vmem>>, vector<16x128xf32>
      %c0_12 = arith.constant 0 : index
      %c0_13 = arith.constant 0 : index
      %13 = vector.load %arg4[%c0_12, %c0_13] : memref<1x128xf32, #tpu.memory_space<vmem>>, vector<1x128xf32>
      %14 = vector.broadcast %13 : vector<1x128xf32> to vector<16x128xf32>
      %15 = arith.addf %12, %14 : vector<16x128xf32>
      %c0_14 = arith.constant 0 : index
      %c0_15 = arith.constant 0 : index
      %16 = vector.load %arg5[%c0_14, %c0_15] : memref<16x128xf32, #tpu.memory_space<vmem>>, vector<16x128xf32>
      tpu.vector_store %arg5[%c0_14, %c0_15], %15 {strides = array<i32>} : memref<16x128xf32, #tpu.memory_space<vmem>>, vector<16x128xf32>,
      %cst_16 = arith.constant 0.000000e+00 : f32
      %17 = vector.broadcast %cst_16 : f32 to vector<16x128xf32>
      %18 = arith.maximumf %15, %17 : vector<16x128xf32>
      %c0_17 = arith.constant 0 : index
      %c0_18 = arith.constant 0 : index
      %19 = vector.load %arg6[%c0_17, %c0_18] : memref<16x128xf32, #tpu.memory_space<vmem>>, vector<16x128xf32>
      tpu.vector_store %arg6[%c0_17, %c0_18], %18 {strides = array<i32>} : memref<16x128xf32, #tpu.memory_space<vmem>>, vector<16x128xf32>,
    } else {
    }
    return
  }
  func.func @transform_0(%arg0: i32, %arg1: i32) -> (i32, i32) {
    %c0_i32 = arith.constant 0 : i32
    return %arg0, %arg1 : i32, i32
  }
  func.func @transform_1(%arg0: i32, %arg1: i32) -> (i32, i32) {
    %c0_i32 = arith.constant 0 : i32
    %c0_i32_0 = arith.constant 0 : i32
    return %arg1, %c0_i32 : i32, i32
  }
  func.func @transform_2(%arg0: i32, %arg1: i32) -> (i32, i32) {
    %c0_i32 = arith.constant 0 : i32
    %c0_i32_0 = arith.constant 0 : i32
    %c0_i32_1 = arith.constant 0 : i32
    return %c0_i32, %c0_i32_0 : i32, i32
  }
  func.func @transform_3(%arg0: i32, %arg1: i32) -> (i32, i32) {
    %c0_i32 = arith.constant 0 : i32
    %c0_i32_0 = arith.constant 0 : i32
    return %arg0, %c0_i32 : i32, i32
  }
  func.func @transform_4(%arg0: i32, %arg1: i32) -> (i32, i32) {
    %c0_i32 = arith.constant 0 : i32
    %c0_i32_0 = arith.constant 0 : i32
    return %arg0, %c0_i32 : i32, i32
  }
}

</mosaic_0001>

<bundles_post_ra>
// kernel: tpu_custom_call.1
= control target key start
LH: loop header
LB: loop body
LE: loop exit
PB: predicated region body
PF: predicated region fallthrough
CT: control target
= control target key end

     0   :  { %10 = vsyncpa [#allocation4], 0  ;;  %s1220_s0 = inlined_call_operand.hbm [shape: bf16[32,128], index: 0, kind: input, shape index: {}]   ;;  %s1221_s1 = inlined_call_operand.hbm [shape: bf16[128,128], index: 1, kind: input, shape index: {}]   ;;  %s1222_s2 = inlined_call_operand.vmem [shape: f32[1,128], index: 2, kind: input, shape index: {}]   ;;  %s1223_s3 = inlined_call_operand.hbm [shape: f32[32,128], index: 3, kind: output, shape index: {0}]   ;;  %s1224_s4 = inlined_call_operand.hbm [shape: f32[32,128], index: 4, kind: output, shape index: {1}]  }
   0x1   :  { %12 = vsyncpa [#allocation4 + $0x1], 0 }
   0x2   :  { %13 = vsyncpa [#allocation7], 0 }
   0x3   :  { %14 = vsyncpa [#allocation5], 0 }
   0x4   :  { %16 = vsyncpa [#allocation5 + $0x1], 0 }
   0x5   :  { %17 = vsyncpa [#allocation10], 0 }
   0x6   :  { %19 = vsyncpa [#allocation10 + $0x1], 0  ;;  %s946_s15 = smov 0   ;;  %s948_s16 = smov 0  }
   0x7   :  { %s950_s17 = smov 0   ;;  %s952_s18 = smov 0  }
   0x8   :  { %s954_s19 = smov 0   ;;  %s956_s20 = smov 0  }
   0x9 LB: > { %s577_s21 = sadd.s32 4294967295, %s909_s20   ;;  %s578_s22 = sadd.s32 4294967294, %s909_s20   ;;  %s909_s20 = sphi %s956_s20, %s25_s20   ;;  %s905_s19 = sphi %s954_s19, %s1248_s19   ;;  %s901_s18 = sphi %s952_s18, %s1247_s18   ;;  %s897_s17 = sphi %s950_s17, %s1246_s17   ;;  %s893_s16 = sphi %s948_s16, %s1245_s16   ;;  %s889_s15 = sphi %s946_s15, %s1244_s15  }
   0xa   : > { %p59_p0 = scmp.ne.s32.totalorder %s893_s16, %s889_s15  ;;  %p980_p1 = scmp.eq.s32.totalorder %s577_s21, 0 }
   0xb   : > { %p984_p2 = scmp.eq.s32.totalorder %s577_s21, 1  ;;  %p136_p3 = scmp.eq.s32.totalorder %s578_s22, 1 }
   0xc   : > { %s1229_s23 = scalar_select %p980_p1, 1, 0 }
   0xd   : > { %s1230_s24 = scalar_select %p984_p2, 1, 0 }
   0xe   : > { %p990_p4 = por %p980_p1, %p59_p0  ;;  %p579_p5 = scmp.ge.s32.totalorder %s909_s20, 1 }
   0xf   : > { %p995_p6 = por %p136_p3, %p59_p0  ;;  %p169_p7 = scmp.lt.s32.totalorder %s909_s20, 3 }
  0x10   : > { %s1231_s25 = scalar_select %p990_p4, 1, 0 }
  0x11   : > { %s1232_s26 = scalar_select %p995_p6, 1, 0 }
  0x12   : > { %p1000_p8 = pnand %p579_p5, %p169_p7  ;;  %s911_s28 = smov [#allocation6]  }
  0x13   : > { %s184_s29 = sshll.u32 %s911_s28, 4  ;;  %s37_s5 = sadd.s32 1, %s905_s19  ;;  %s185_s29 = int_to_ptr.vmem [resolvable:$true] %s184_s29 }
  0x14   : > { %s1233_s27 = scalar_select %p1000_p8, 1, 0 }
  0x15   : > { %p650_p9 = pneg %p1000_p8  ;;  %s733_s8 = scalar_lea.hbm %s1221_s1, 1024 }
  0x16   : > { %p734_p12 = scmp.ne.s32.totalorder %s1221_s1, %s733_s8  ;;  %p740_p5 = scmp.lt.u32.totalorder %s733_s8, %s1221_s1 }
  0x17   : > { %p1009_p11 = pnand %p650_p9, %p980_p1 }
  0x19   : > { %p735_p13 = pneg %p1009_p11 }
  0x1b   : > { %p736_p0 = pnand %p735_p13, %p734_p12 }
  0x1d   : > { %p737_p3 = pneg %p736_p0 }
  0x1f   : > { %p742_p7 = pnand %p740_p5, %p737_p3 }
  0x21   : > { %745 = shalt.err (!%p742_p7)
}
  0x22   : > { %s746_s13 = scalar_lea.vmem %s185_s29, 1024  ;;  %p754_p1 = scmp.lt.s32.totalorder %s185_s29, %s185_s29 }
  0x23   : > { %p747_p9 = scmp.ne.s32.totalorder %s185_s29, %s746_s13  ;;  %p755_p4 = scmp.lt.s32.totalorder %s746_s13, %s746_s13 }
  0x25   : > { %p749_p10 = pnand %p747_p9, %p735_p13  ;;  %p756_p8 = por %p755_p4, %p754_p1 }
  0x27   : > { %p750_p6 = pneg %p749_p10 }
  0x29   : > { %p757_p2 = pnand %p756_p8, %p750_p6 }
  0x2b   : > { %760 = shalt.err (!%p757_p2)
}
  0x2c   : > { %s912_s14 = smov 64   ;;  %s913_s21 = smov 4  }
  0x2d   : > { %653 = dma.hbm_to_vmem [thread:$0]  (!%p1009_p11), %s1221_s1, 1024, %s185_s29, [#allocation7], %s912_s14, %s912_s14, %s913_s21  }
  0x2e   : > { %p39_p1 = scmp.ge.s32.totalorder %s37_s5, 2  ;;  %s46_s6 = sadd.s32 1, %s897_s17 }
  0x2f   : > { %p53_p2 = scmp.ne.s32.totalorder %s897_s17, %s893_s16  ;;  %p54_p4 = scmp.eq.s32.totalorder %s909_s20, 0 }
  0x30   : > { %s1250_s5 = smov (%p39_p1, %s37_s5), 0  ;;  %p1236_p8 = scmp.ne.s32.totalorder %s1230_s24, 0 }
  0x31   : > { %p1039_p6 = por %p54_p4, %p53_p2  ;;  %s41_s8 = ssub.s32 %s905_s19, %s1250_s5 }
  0x32   : > { %p1045_p10 = por %p1236_p8, %p53_p2  ;;  %p666_p12 = scmp.lt.s32.totalorder %s909_s20, 2 }
  0x33   : > { %p44_p11 = scmp.eq.s32.totalorder %s41_s8, 0  ;;  %s201_s29 = sand.u32 1, %s897_s17  }
  0x34   : > { %s582_s9 = sshll.u32 %s201_s29, 3  ;;  %s608_s11 = sshll.u32 %s905_s19, 7 }
  0x35   : > { %s1054_s10 = scalar_select %p44_p11, %s897_s17, %s46_s6  }
  0x36   : > { %s1060_s22 = scalar_lea.hbm %s1220_s0, %s608_s11  ;;  %s205_s24 = scalar_lea.vmem [#allocation3], %s582_s9 }
  0x37   : > { %s213_s28 = sshll.u32 %s205_s24, 4  ;;  %p1066_p13 = pnand %p666_p12, %p1039_p6  ;;  %s1062_s28 = int_to_ptr.vmem [resolvable:$true] %s213_s28 }
  0x38   : > { %s1070_s6 = scalar_lea.sflag [#allocation4], %s201_s29  ;;  %s761_s12 = scalar_lea.hbm %s1060_s22, 128 }
  0x39   : > { %p762_p0 = scmp.ne.s32.totalorder %s1060_s22, %s761_s12  ;;  %p763_p3 = pneg %p1066_p13 }
  0x3a   : > { %s766_s7 = scalar_lea.hbm %s1220_s0, 256  ;;  %p767_p9 = scmp.lt.u32.totalorder %s1060_s22, %s1220_s0 }
  0x3b   : > { %p764_p5 = pnand %p763_p3, %p762_p0  ;;  %p768_p1 = scmp.lt.u32.totalorder %s766_s7, %s761_s12 }
  0x3c   : > { %p770_p4 = scmp.lt.u32.totalorder %s761_s12, %s1060_s22 }
  0x3d   : > { %p765_p7 = pneg %p764_p5  ;;  %p769_p2 = por %p768_p1, %p767_p9 }
  0x3f   : > { %p771_p6 = por %p770_p4, %p769_p2 }
  0x41   : > { %p772_p8 = pnand %p771_p6, %p765_p7 }
  0x43   : > { %775 = shalt.err (!%p772_p8)
}
  0x44   : > { %s776_s29 = scalar_lea.vmem %s1062_s28, 128  ;;  %s914_s9 = smov [#allocation3]  }
  0x45   : > { %p777_p12 = scmp.ne.s32.totalorder %s1062_s28, %s776_s29  ;;  %s781_s11 = sshll.u32 %s914_s9, 4  ;;  %s782_s11 = int_to_ptr.vmem [resolvable:$false] %s781_s11 }
  0x46   : > { %s783_s13 = scalar_lea.vmem %s782_s11, 256  ;;  %p784_p5 = scmp.lt.s32.totalorder %s1062_s28, %s782_s11 }
  0x47   : > { %p779_p11 = pnand %p777_p12, %p763_p3  ;;  %p785_p9 = scmp.lt.s32.totalorder %s783_s13, %s776_s29 }
  0x49   : > { %p780_p0 = pneg %p779_p11  ;;  %p786_p1 = por %p785_p9, %p784_p5 }
  0x4b   : > { %p787_p2 = pnand %p786_p1, %p780_p0 }
  0x4d   : > { %790 = shalt.err (!%p787_p2)
}
  0x4e   : > { %657 = dma.hbm_to_vmem [thread:$0]  (!%p1066_p13), %s1060_s22, 128, %s1062_s28, %s1070_s6, %s912_s14, %s912_s14, %s913_s21  }
  0x4f   : > { %p1239_p3 = scmp.ne.s32.totalorder %s1233_s27, 0 }
  0x50   : > { %s1104_s12 = sand.u32 (!%p1239_p3), 1, %s893_s16   ;;  %p1240_p7 = scmp.ne.s32.totalorder (!%p1239_p3), %s1231_s25, 0 }
  0x51   : > { %225 = sbr.rel (%p1239_p3) target bundleno = 379 (0x17b), region = 32  ;;  %s586_s7 = sshll.u32 (!%p1239_p3), %s1104_s12, 3 }
  0x52   : > { %s228_s24 = scalar_lea.sflag (!%p1239_p3), [#allocation4], %s1104_s12  ;;  %s1108_s29 = scalar_lea.vmem (!%p1239_p3), [#allocation3], %s586_s7 }
  0x58   : > { %872 = dma.done.wait (%p1240_p7), %s228_s24, 128  }
  0x59   : > { %874 = vsyncadd (%p1240_p7), %s228_s24, 4294967168  ;;  %p1241_p13 = scmp.ne.s32.totalorder %s1229_s23, 0 }
  0x5b   : > { %876 = dma.done.wait (%p1241_p13), [#allocation7], 1024  }
  0x5c   : > { %878 = vsyncadd (%p1241_p13), [#allocation7], 4294966272  ;;  %v915_v0 = vmov 0.0   ;;  %vm916_vm0 = vmmov 0   ;;  %v724_v1 = vld [vmem:[#allocation6] sm:$0xff]   ;;  %v725_v2 = vld [vmem:[#allocation6 + $0x8] sm:$0xff]  }
  0x5d   : > { %620 = vmatprep.subr.bf16.mxu0 %v915_v0  ;;  %636 = vmatprep.mubr.msk.bf16.mxu0 %vm916_vm0, %v915_v0  ;;  %v726_v3 = vld [vmem:[#allocation6 + $0x10] sm:$0xff]   ;;  %v727_v4 = vld [vmem:[#allocation6 + $0x18] sm:$0xff]   ;;  %v728_v5 = vld [vmem:[#allocation6 + $0x20] sm:$0xff]   ;;  %s588_s23 = sshll.u32 %s1104_s12, 4  ;;  %s609_s22 = sshll.u32 %s901_s18, 8 }
  0x5e   : > { %621 = vmatpush3.bf16.msra.mxu0 %v724_v1  ;;  %v729_v6 = vld [vmem:[#allocation6 + $0x28] sm:$0xff]   ;;  %v730_v7 = vld [vmem:[#allocation6 + $0x30] sm:$0xff]   ;;  %v731_v8 = vld [vmem:[#allocation6 + $0x38] sm:$0xff]   ;;  %s257_s14 = scalar_lea.vmem [#allocation8], %s588_s23  ;;  %s1126_s28 = scalar_lea.vmem [#allocation9], %s588_s23 }
  0x5f   : > { %622 = vmatprep.subr.bf16.mxu0 %v915_v0  ;;  %v732_v9 = vld [vmem:[%s1108_s29] sm:$0xff]   ;;  %s434_s21 = sshll.u32 %s257_s14, 4  ;;  %s450_s8 = sshll.u32 %s1126_s28, 4  ;;  %s1124_s21 = int_to_ptr.vmem [resolvable:$true] %s434_s21  ;;  %s1134_s8 = int_to_ptr.vmem [resolvable:$true] %s450_s8 }
  0x60   : > { %v599_v10 = vld [vmem:[%s1222_s2] ss:$0 sm:$0xff]  ;;  %s1132_s11 = scalar_lea.hbm %s1223_s3, %s609_s22  ;;  %s1140_s7 = scalar_lea.hbm %s1224_s4, %s609_s22 }
  0x61   : > { %s416_s24 = scalar_lea.sflag [#allocation5], %s1104_s12  ;;  %s791_s29 = scalar_lea.vmem %s1124_s21, 256 }
  0x62   : > { %623 = vmatpush3.bf16.msra.mxu0 %v725_v2  ;;  %p792_p4 = scmp.ne.s32.totalorder %s1124_s21, %s791_s29  ;;  %s917_s23 = smov [#allocation8]  }
  0x63   : > { %624 = vmatprep.subr.bf16.mxu0 %v915_v0  ;;  %s795_s25 = sshll.u32 %s917_s23, 4  ;;  %s796_s25 = int_to_ptr.vmem [resolvable:$false] %s795_s25 }
  0x64   : > { %p793_p6 = pnand %p792_p4, %p1045_p10  ;;  %s797_s27 = scalar_lea.vmem %s796_s25, 512 }
  0x65   : > { %p798_p12 = scmp.lt.s32.totalorder %s1124_s21, %s796_s25  ;;  %p799_p11 = scmp.lt.s32.totalorder %s797_s27, %s791_s29 }
  0x66   : > { %625 = vmatpush3.bf16.msra.mxu0 %v726_v3  ;;  %p794_p8 = pneg %p793_p6 }
  0x67   : > { %626 = vmatprep.subr.bf16.mxu0 %v915_v0  ;;  %p800_p0 = por %p799_p11, %p798_p12 }
  0x69   : > { %p801_p5 = pnand %p800_p0, %p794_p8 }
  0x6a   : > { %627 = vmatpush3.bf16.msra.mxu0 %v727_v4 }
  0x6b   : > { %628 = vmatprep.subr.bf16.mxu0 %v915_v0 }
  0x6e   : > { %629 = vmatpush3.bf16.msra.mxu0 %v728_v5 }
  0x6f   : > { %630 = vmatprep.subr.bf16.mxu0 %v915_v0 }
  0x72   : > { %631 = vmatpush3.bf16.msra.mxu0 %v729_v6 }
  0x73   : > { %632 = vmatprep.subr.bf16.mxu0 %v915_v0 }
  0x76   : > { %633 = vmatpush3.bf16.msra.mxu0 %v730_v7 }
  0x77   : > { %634 = vmatprep.subr.bf16.mxu0 %v915_v0 }
  0x7a   : > { %635 = vmatpush3.bf16.msra.mxu0 %v731_v8 }
  0x7d   : > { %637 = vmatmul.mubr.bf16.vlgmr.msra.gmra.mrb[0].mxu0 %v732_v9 }
 0x150   : > { %v384_v11 = vpop.f32.mrb[0].mxu0 }
 0x151   : > { %v407_v12 = vadd.f32 %v599_v10, %v384_v11  ;;  %v638_v13 = vpop.f32.mrb[1].mxu0 }
 0x152   : > { %v387_v14 = vpop.f32.mrb[2].mxu0 }
 0x153   : > { %409 = vst [vmem:[%s257_s14] sm:$0xff] %v407_v12  ;;  %v411_v15 = vmax.f32 %v407_v12, 0.0  ;;  %v408_v16 = vadd.f32 %v599_v10, %v387_v14  ;;  %v639_v17 = vpop.f32.mrb[3].mxu0 }
 0x155   : > { %413 = vst [vmem:[%s1126_s28] sm:$0xff] %v411_v15  ;;  %410 = vst [vmem:[%s257_s14 + $0x8] sm:$0xff] %v408_v16  ;;  %v412_v18 = vmax.f32 %v408_v16, 0.0 }
 0x156   : > { %804 = shalt.err (!%p801_p5)
}
 0x157   : > { %s805_s14 = scalar_lea.hbm %s1132_s11, 256  ;;  %s809_s9 = scalar_lea.hbm %s1223_s3, 512 }
 0x158   : > { %p806_p9 = scmp.ne.s32.totalorder %s1132_s11, %s805_s14  ;;  %p810_p3 = scmp.lt.u32.totalorder %s1132_s11, %s1223_s3 }
 0x159   : > { %p811_p7 = scmp.lt.u32.totalorder %s809_s9, %s805_s14  ;;  %p813_p4 = scmp.lt.u32.totalorder %s805_s14, %s1132_s11 }
 0x15a   : > { %p807_p1 = pnand %p806_p9, %p1045_p10 }
 0x15b   : > { %p812_p13 = por %p811_p7, %p810_p3 }
 0x15c   : > { %p808_p2 = pneg %p807_p1 }
 0x15d   : > { %p814_p6 = por %p813_p4, %p812_p13 }
 0x15f   : > { %p815_p8 = pnand %p814_p6, %p808_p2 }
 0x161   : > { %818 = shalt.err (!%p815_p8)
}
 0x162   : > { %s918_s29 = smov 128   ;;  %s919_s23 = smov 8   ;;  %414 = vst [vmem:[%s1126_s28 + $0x8] sm:$0xff] %v412_v18 }
 0x163   : > { %646 = dma.vmem_to_hbm [thread:$0]  (%p1045_p10), %s1124_s21, 256, %s1132_s11, %s416_s24, %s918_s29, %s918_s29, %s919_s23  }
 0x164   : > { %s421_s25 = scalar_lea.sflag [#allocation10], %s1104_s12  ;;  %s819_s27 = scalar_lea.vmem %s1134_s8, 256 }
 0x165   : > { %p820_p12 = scmp.ne.s32.totalorder %s1134_s8, %s819_s27  ;;  %s920_s14 = smov [#allocation9]  }
 0x166   : > { %s823_s22 = sshll.u32 %s920_s14, 4  ;;  %s824_s22 = int_to_ptr.vmem [resolvable:$false] %s823_s22 }
 0x167   : > { %p821_p11 = pnand %p820_p12, %p1045_p10  ;;  %s825_s6 = scalar_lea.vmem %s824_s22, 512 }
 0x168   : > { %p826_p5 = scmp.lt.s32.totalorder %s1134_s8, %s824_s22  ;;  %p827_p9 = scmp.lt.s32.totalorder %s825_s6, %s819_s27 }
 0x169   : > { %p822_p0 = pneg %p821_p11 }
 0x16a   : > { %p828_p1 = por %p827_p9, %p826_p5 }
 0x16c   : > { %p829_p2 = pnand %p828_p1, %p822_p0 }
 0x16e   : > { %832 = shalt.err (!%p829_p2)
}
 0x16f   : > { %s833_s21 = scalar_lea.hbm %s1140_s7, 256  ;;  %s837_s24 = scalar_lea.hbm %s1224_s4, 512 }
 0x170   : > { %p834_p3 = scmp.ne.s32.totalorder %s1140_s7, %s833_s21  ;;  %p838_p4 = scmp.lt.u32.totalorder %s1140_s7, %s1224_s4 }
 0x171   : > { %p839_p6 = scmp.lt.u32.totalorder %s837_s24, %s833_s21  ;;  %p841_p12 = scmp.lt.u32.totalorder %s833_s21, %s1140_s7 }
 0x172   : > { %p835_p7 = pnand %p834_p3, %p1045_p10 }
 0x173   : > { %p840_p8 = por %p839_p6, %p838_p4 }
 0x174   : > { %p836_p13 = pneg %p835_p7 }
 0x175   : > { %p842_p11 = por %p841_p12, %p840_p8 }
 0x177   : > { %p843_p0 = pnand %p842_p11, %p836_p13 }
 0x179   : > { %846 = shalt.err (!%p843_p0)
}
 0x17a   : > { %647 = dma.vmem_to_hbm [thread:$0]  (%p1045_p10), %s1134_s8, 256, %s1140_s7, %s421_s25, %s918_s29, %s918_s29, %s919_s23  }
 0x17b PF: > { %s465_s13 = sand.u32 1, %s889_s15   ;;  %p1242_p5 = scmp.ne.s32.totalorder %s1232_s26, 0 }
 0x17c   : > { %p1243_p9 = scmp.ge.s32.totalorder %s909_s20, 2  ;;  %s466_s27 = scalar_lea.sflag [#allocation5], %s465_s13 }
 0x17e   : > { %p659_p1 = pnand %p1243_p9, %p1242_p5 }
 0x180   : > { %880 = dma.done.wait (!%p659_p1), %s466_s27, 256  }
 0x181   : > { %882 = vsyncadd (!%p659_p1), %s466_s27, 4294967040  ;;  %s475_s30 = scalar_lea.sflag [#allocation10], %s465_s13 }
 0x182   : > { %884 = dma.done.wait (!%p659_p1), %s475_s30, 256  }
 0x183   : > { %886 = vsyncadd (!%p659_p1), %s475_s30, 4294967040  ;;  %s25_s20 = sadd.s32 1, %s909_s20   ;;  %s1244_s15 = smov %s893_s16 }
 0x184   : > { %p22_p2 = scmp.ge.s32.totalorder %s25_s20, 4   ;;  %s1245_s16 = smov %s897_s17 }
 0x185   : > { %s1246_s17 = smov %s1054_s10  ;;  %s1247_s18 = smov %s905_s19 }
 0x186   : > { %s1248_s19 = smov %s1250_s5  ;;  %24 = sbr.rel (!%p22_p2) target bundleno = 9 (0x9), region = 107 }
 0x18d   :  { %480 = vsyncpa [#allocation4], 1 }
 0x18e   :  { %482 = vsyncpa [#allocation4 + $0x1], 1 }
 0x18f   :  { %483 = vsyncpa [#allocation7], 1 }
 0x190   :  { %484 = vsyncpa [#allocation5], 1 }
 0x191   :  { %486 = vsyncpa [#allocation5 + $0x1], 1 }
 0x192   :  { %487 = vsyncpa [#allocation10], 1 }
 0x193   :  { %489 = vsyncpa [#allocation10 + $0x1], 1 }

</bundles_post_ra>
